<compile_context>
chip_gen: v6e
topology: v6e:2x2x1
jax: 0.10.0
libtpu: 0.0.40
codegen_flags: <defaults>
</compile_context>

<pallas_src>
import jax
import jax.numpy as jnp
from jax.experimental import pallas as pl
from jax.experimental.pallas import tpu as pltpu


# ---------------------------------------------------------------------------
# Deterministic parameter construction (mirrors __init__; unused by forward).
# ---------------------------------------------------------------------------
def init_attention_network_params(n, hidden_layers, key):
    """Builds weights/biases for self.layers and self.attentions.

    Shapes follow nn.Linear(in_features, out_features):
      weight: (out, in), bias: (out,)
    """
    dims = [n] + list(hidden_layers) + [n]
    params = {"layers": [], "attentions": []}
    for name in ("layers", "attentions"):
        for d_in, d_out in zip(dims[:-1], dims[1:]):
            key, k_w, k_b = jax.random.split(key, 3)
            bound = 1.0 / jnp.sqrt(jnp.float32(d_in))
            w = jax.random.uniform(k_w, (d_out, d_in), jnp.float32, -bound, bound)
            b = jax.random.uniform(k_b, (d_out,), jnp.float32, -bound, bound)
            params[name].append((w, b))
    return params


# ---------------------------------------------------------------------------
# Pallas kernel: identity forward pass (copy of the current tile).
# ---------------------------------------------------------------------------
def _identity_kernel(x_ref, o_ref):
    o_ref[...] = x_ref[...]


_MAX_TILE_ROWS = 512               # ~85% of HBM roofline for mem-bound copies
_TARGET_TILE_BYTES = 4 * 1024 * 1024   # keep double-buffered footprint << 64 MiB (v7x)


def _choose_tile_rows(rows, cols, itemsize):
    """Pick a legal (8,128)-aligned row tile sized for VMEM & pipelining."""
    if cols % 128 != 0 or rows <= 8:
        return rows                       # full-array block is always legal
    bytes_per_row = cols * itemsize
    budget_rows = max(8, (_TARGET_TILE_BYTES // bytes_per_row) // 8 * 8)
    tile = min(_MAX_TILE_ROWS, budget_rows)
    if rows <= tile:
        return rows                       # single full block
    return tile                           # multiple of 8; ragged tail is masked


def _pallas_identity_2d(x2):
    rows, cols = x2.shape
    tile_rows = _choose_tile_rows(rows, cols, x2.dtype.itemsize)
    grid = (pl.cdiv(rows, tile_rows),)
    return pl.pallas_call(
        _identity_kernel,
        out_shape=jax.ShapeDtypeStruct((rows, cols), x2.dtype),
        grid=grid,
        in_specs=[pl.BlockSpec((tile_rows, cols), lambda i: (i, 0))],
        out_specs=pl.BlockSpec((tile_rows, cols), lambda i: (i, 0)),
        # Identity: let the output alias the input buffer — no extra HBM
        # write-back allocation is needed.
        input_output_aliases={0: 0},
        compiler_params=pltpu.CompilerParams(
            dimension_semantics=("parallel",),   # shard tiles across v7x's 2 TCs
        ),
    )(x2)


def attention_network_forward(x, params=None):
    """Forward pass of AttentionNetwork: returns x unchanged.

    The PyTorch forward performs no compute (loop body is `pass`), so the
    production fast path would be `return x`.  Here we route through an
    optimized Pallas identity kernel to exercise the TPU path.
    `params` is accepted (and ignored) to mirror the module's unused Linears.
    """
    del params  # forward() never touches the parameters
    batch, n = x.shape
    total = batch * n

    # Present a lane-dense (last dim multiple of 128) view to the kernel when
    # possible so stores are unmasked full-vreg vst; otherwise fall back to a
    # single full-array block (always legal).
    if n % 128 == 0:
        x2 = x
    elif total % 128 == 0:
        x2 = x.reshape(total // 128, 128)
    else:
        x2 = x

    y2 = _pallas_identity_2d(x2)
    return y2.reshape(batch, n)


if __name__ == "__main__":
    key = jax.random.PRNGKey(0)
    k_param, k_x, k_x2 = jax.random.split(key, 3)

    n = 32
    hidden_layers = [64, 16]
    batch = 2

    params = init_attention_network_params(n, hidden_layers, k_param)
    x = jax.random.normal(k_x, (batch, n), dtype=jnp.float32)

    y = attention_network_forward(x, params)
    y = jax.block_until_ready(y)

    # Forward is the identity — verify against the reference semantics.
    assert y.shape == x.shape and y.dtype == x.dtype
    assert bool(jnp.all(y == x))

    # Also exercise the lane-dense branch (last dim multiple of 128).
    x_dense = jax.random.normal(k_x2, (8, 128), dtype=jnp.float32)
    y_dense = jax.block_until_ready(attention_network_forward(x_dense, params))
    assert bool(jnp.all(y_dense == x_dense))

    print("KERNEL_OK")
</pallas_src>

<mosaic_0001>
module attributes {stable_mosaic.version = 11 : i64} {
  func.func @_identity_kernel(%arg0: i32, %arg1: memref<2x32xf32, #tpu.memory_space<vmem>>, %arg2: memref<2x32xf32, #tpu.memory_space<vmem>>) attributes {dimension_semantics = [#tpu.dimension_semantics<parallel>], iteration_bounds = array<i64: 1>, scalar_prefetch = 0 : i64, scratch_operands = 0 : i64, tpu.core_type = #tpu.core_type<tc>, window_params = [{transform_indices = @transform_0, window_bounds = array<i64: 2, 32>}, {transform_indices = @transform_1, window_bounds = array<i64: 2, 32>}]} {
    %c0 = arith.constant 0 : index
    %c0_0 = arith.constant 0 : index
    %0 = vector.load %arg1[%c0, %c0_0] : memref<2x32xf32, #tpu.memory_space<vmem>>, vector<2x32xf32>
    %c0_1 = arith.constant 0 : index
    %c0_2 = arith.constant 0 : index
    %1 = vector.load %arg2[%c0_1, %c0_2] : memref<2x32xf32, #tpu.memory_space<vmem>>, vector<2x32xf32>
    tpu.vector_store %arg2[%c0_1, %c0_2], %0 {strides = array<i32>} : memref<2x32xf32, #tpu.memory_space<vmem>>, vector<2x32xf32>,
    return
  }
  func.func @transform_0(%arg0: i32) -> (i32, i32) {
    %c0_i32 = arith.constant 0 : i32
    %c0_i32_0 = arith.constant 0 : i32
    return %arg0, %c0_i32 : i32, i32
  }
  func.func @transform_1(%arg0: i32) -> (i32, i32) {
    %c0_i32 = arith.constant 0 : i32
    %c0_i32_0 = arith.constant 0 : i32
    return %arg0, %c0_i32 : i32, i32
  }
}

</mosaic_0001>

<bundles_post_ra>
// kernel: tpu_custom_call.1
= control target key start
LH: loop header
LB: loop body
LE: loop exit
PB: predicated region body
PF: predicated region fallthrough
CT: control target
= control target key end

     0   :  { %6 = vsyncpa [#allocation3], 0  ;;  %s103_s0 = inlined_call_operand.hbm [shape: f32[2,32], index: 0, kind: input, shape index: {}, may-alias: {0,1}]   ;;  %s104_s1 = inlined_call_operand.hbm [shape: f32[2,32], index: 1, kind: output, shape index: {}, may-alias: {0,1}]  }
   0x1   :  { %7 = vsyncpa [#allocation4], 0  ;;  %s85_s6 = smov [#allocation2]  }
   0x2   :  { %s14_s7 = sshll.u32 %s85_s6, 4  ;;  %s15_s7 = int_to_ptr.vmem [resolvable:$true] %s14_s7 }
   0x3   :  { %s49_s8 = scalar_lea.vmem %s15_s7, 32  ;;  %p54_p1 = scmp.lt.s32.totalorder %s15_s7, %s15_s7 }
   0x4   :  { %p50_p0 = scmp.ne.s32.totalorder %s15_s7, %s49_s8  ;;  %p55_p2 = scmp.lt.s32.totalorder %s49_s8, %s49_s8 }
   0x6   :  { %p56_p3 = por %p55_p2, %p54_p1 }
   0x8   :  { %p57_p4 = pnand %p56_p3, %p50_p0 }
   0xa   :  { %60 = shalt.err (!%p57_p4)
}
   0xb   :  { %17 = dma.hbm_to_vmem [thread:$0]  %s103_s0, 32, %s15_s7, [#allocation3]  }
   0xc   :  { %81 = dma.done.wait [#allocation3], 32  }
   0xd   :  { %82 = vsyncadd [#allocation3], 4294967264  ;;  %s86_s11 = smov [#allocation5]   ;;  %vm22_vm0 = vcmask 254976   ;;  %v21_v0 = vld [vmem:[#allocation2] sm:$0x3] }
   0xe   :  { %s30_s12 = sshll.u32 %s86_s11, 4  ;;  %23 = vst.msk [vmem:[#allocation5] sm:$0x3] %vm22_vm0, %v21_v0  ;;  %s31_s12 = int_to_ptr.vmem [resolvable:$true] %s30_s12 }
   0xf   :  { %s61_s13 = scalar_lea.vmem %s31_s12, 32  ;;  %p66_p6 = scmp.lt.s32.totalorder %s31_s12, %s31_s12 }
  0x10   :  { %p62_p5 = scmp.ne.s32.totalorder %s31_s12, %s61_s13  ;;  %p67_p7 = scmp.lt.s32.totalorder %s61_s13, %s61_s13 }
  0x12   :  { %p68_p8 = por %p67_p7, %p66_p6 }
  0x14   :  { %p69_p9 = pnand %p68_p8, %p62_p5 }
  0x16   :  { %72 = shalt.err (!%p69_p9)
}
  0x17   :  { %33 = dma.vmem_to_hbm [thread:$0]  %s31_s12, 32, %s104_s1, [#allocation4]  }
  0x18   :  { %83 = dma.done.wait [#allocation4], 32  }
  0x19   :  { %84 = vsyncadd [#allocation4], 4294967264 }
  0x1a   :  { %37 = vsyncpa [#allocation3], 1 }
  0x1b   :  { %38 = vsyncpa [#allocation4], 1 }

</bundles_post_ra>
